<compile_context>
chip_gen: v5e
topology: v5e:2x2
jax: 0.10.0
libtpu: 0.0.40
codegen_flags: <defaults>
</compile_context>

<pallas_src>
import jax
import jax.numpy as jnp
from jax.experimental import pallas as pl
from jax.experimental.pallas import tpu as pltpu


def _round_up(x, m):
    return ((x + m - 1) // m) * m


# ---------------------------------------------------------------------------
# Fused kernel factory: cell1 -> cell2 -> cell3, everything stays in VMEM/vregs.
# All offsets are static Python ints (closure), so every slice is a free view.
# ---------------------------------------------------------------------------
def _make_kernel(in_sz, H1, H2, H3, in_off, w_off, out_off):

    def sigmoid(z):
        # exp lands on the EUP; exact reciprocal keeps 1e-5 parity with the reference.
        # On v5e, approx=True moves the divide onto the (otherwise idle) EUP rcp slot.
        return pl.reciprocal(1.0 + jnp.exp(-z), approx=False)

    def gate_math(gates, c_prev, H):
        # gate column order is [i, f, o, g] (pre-permuted in pack_params)
        sg = sigmoid(gates[:, 0:3 * H])          # one contiguous sigmoid
        i_g = sg[:, 0 * H:1 * H]
        f_g = sg[:, 1 * H:2 * H]
        o_g = sg[:, 2 * H:3 * H]
        g_g = jnp.tanh(gates[:, 3 * H:4 * H])    # one contiguous tanh
        c_new = f_g * c_prev + i_g * g_g
        h_new = o_g * jnp.tanh(c_new)
        return h_new, c_new

    def kernel(in_ref, w_ref, b_ref, out_ref):
        x = in_ref[...]                                       # (B, in_width), one dense load

        # ---- cell 1: gates = [x_in | h0] @ W1_fused + b1 (no in-kernel concat) ----
        xh1 = x[:, in_off["x"]:in_off["x"] + in_sz + H1]
        c0 = x[:, in_off["c0"]:in_off["c0"] + H1]
        g1 = jnp.dot(xh1, w_ref[w_off["w1"]:w_off["w1"] + in_sz + H1, :],
                     preferred_element_type=jnp.float32) + b_ref[0:1, :]
        h1n, c1n = gate_math(g1, c0, H1)

        # ---- cell 2: gates = h1_new @ W2x + h1_prev @ W2h + b2 (split weights) ----
        h1p = x[:, in_off["h1"]:in_off["h1"] + H2]
        c1p = x[:, in_off["c1"]:in_off["c1"] + H2]
        g2 = (jnp.dot(h1n, w_ref[w_off["w2x"]:w_off["w2x"] + H1, :],
                      preferred_element_type=jnp.float32)
              + jnp.dot(h1p, w_ref[w_off["w2h"]:w_off["w2h"] + H2, :],
                        preferred_element_type=jnp.float32)
              + b_ref[1:2, :])
        h2n, c2n = gate_math(g2, c1p, H2)

        # ---- cell 3: gates = h2_new @ W3x + h2_prev @ W3h + b3 (lane-padded to 128) ----
        h2p = x[:, in_off["h2"]:in_off["h2"] + H3]
        c2p = x[:, in_off["c2"]:in_off["c2"] + H3]
        g3 = (jnp.dot(h2n, w_ref[w_off["w3x"]:w_off["w3x"] + H2, :],
                      preferred_element_type=jnp.float32)
              + jnp.dot(h2p, w_ref[w_off["w3h"]:w_off["w3h"] + H3, :],
                        preferred_element_type=jnp.float32)
              + b_ref[2:3, :])
        h3n, c3n = gate_math(g3[:, 0:4 * H3], c2p, H3)

        # ---- single lane-dense output slab (dense HBM writeback) ----
        out_ref[...] = jnp.zeros(out_ref.shape, out_ref.dtype)
        out_ref[:, out_off["h1"]:out_off["h1"] + H1] = h1n
        out_ref[:, out_off["c1"]:out_off["c1"] + H1] = c1n
        out_ref[:, out_off["h2"]:out_off["h2"] + H2] = h2n
        out_ref[:, out_off["c2"]:out_off["c2"] + H2] = c2n
        out_ref[:, out_off["h3"]:out_off["h3"] + H3] = h3n
        out_ref[:, out_off["c3"]:out_off["c3"] + H3] = c3n

    return kernel


# ---------------------------------------------------------------------------
# Parameter construction / packing
# ---------------------------------------------------------------------------
def make_lstm_cell_params(key, input_size, hidden_size):
    """Raw PyTorch-style LSTMCell params (gate order i, f, g, o)."""
    k1, k2, k3, k4 = jax.random.split(key, 4)
    bound = 1.0 / jnp.sqrt(hidden_size)
    w_ih = jax.random.uniform(k1, (4 * hidden_size, input_size),
                              minval=-bound, maxval=bound, dtype=jnp.float32)
    w_hh = jax.random.uniform(k2, (4 * hidden_size, hidden_size),
                              minval=-bound, maxval=bound, dtype=jnp.float32)
    b_ih = jax.random.uniform(k3, (4 * hidden_size,),
                              minval=-bound, maxval=bound, dtype=jnp.float32)
    b_hh = jax.random.uniform(k4, (4 * hidden_size,),
                              minval=-bound, maxval=bound, dtype=jnp.float32)
    return dict(w_ih=w_ih, w_hh=w_hh, b_ih=b_ih, b_hh=b_hh)


def _prep_cell(p, H):
    """Permute gate columns to [i,f,o,g], transpose to (In,4H)/(H,4H), merge biases."""
    perm = jnp.concatenate([jnp.arange(0, 2 * H),          # i, f
                            jnp.arange(3 * H, 4 * H),      # o
                            jnp.arange(2 * H, 3 * H)])     # g
    w_x = p["w_ih"][perm, :].T          # (In, 4H)
    w_h = p["w_hh"][perm, :].T          # (H, 4H)
    b = (p["b_ih"] + p["b_hh"])[perm]   # (4H,)
    return w_x, w_h, b


def pack_params(raw, i_size, H1, H2, H3, weight_dtype=jnp.float32):
    """Stack all weights into one (rows, 128) sublane-stacked array and all biases
    into one (3, 128) array. Cell 1's W_ih/W_hh are fused (input is [x|h0]);
    cells 2/3 keep W_x / W_h split so the kernel needs no lane concat."""
    w1x, w1h, b1 = _prep_cell(raw["lay1"], H1)
    w2x, w2h, b2 = _prep_cell(raw["lay2"], H2)
    w3x, w3h, b3 = _prep_cell(raw["out"], H3)

    lanes = _round_up(max(4 * H1, 4 * H2, 4 * H3, 128), 128)

    def pad_lanes(w):
        return jnp.pad(w, ((0, 0), (0, lanes - w.shape[1])))

    blocks = [("w1", jnp.concatenate([w1x, w1h], axis=0)),   # (i_size+H1, 4H1)
              ("w2x", w2x), ("w2h", w2h),
              ("w3x", w3x), ("w3h", w3h)]

    w_off, rows, off = {}, [], 0
    for name, blk in blocks:
        blk = pad_lanes(blk)
        w_off[name] = off
        r = _round_up(blk.shape[0], 8)          # keep every block start sublane-aligned
        rows.append(jnp.pad(blk, ((0, r - blk.shape[0]), (0, 0))))
        off += r
    w_packed = jnp.concatenate(rows, axis=0).astype(weight_dtype)   # (152, 128) at defaults

    def pad_bias(b):
        return jnp.pad(b, (0, lanes - b.shape[0]))
    b_packed = jnp.stack([pad_bias(b1), pad_bias(b2), pad_bias(b3)], axis=0).astype(jnp.float32)

    return dict(w=w_packed, b=b_packed, w_off=w_off, lanes=lanes)


# ---------------------------------------------------------------------------
# Wrapper matching Wifi_fullLSTMCells.forward
# ---------------------------------------------------------------------------
def wifi_full_lstm_cells_forward(packed, x_in, h0, c0, h1, c1, h2, c2):
    B, i_size = x_in.shape
    H1, H2, H3 = h0.shape[1], h1.shape[1], h2.shape[1]

    # ---- pack the 7 state tensors into ONE lane-dense slab (1 DMA) ----------
    # Order: [x | h0] adjacent (cell-1 operand), and at the default sizes no
    # used slice straddles a 128-lane vreg boundary.
    order = [("x", x_in), ("h0", h0), ("c0", c0), ("h1", h1),
             ("h2", h2), ("c2", c2), ("c1", c1)]
    in_off, off = {}, 0
    for name, arr in order:
        in_off[name] = off
        off += arr.shape[1]
    in_width = _round_up(off, 128)
    parts = [arr.astype(jnp.float32) for _, arr in order]
    if in_width > off:
        parts.append(jnp.zeros((B, in_width - off), jnp.float32))
    in_packed = jnp.concatenate(parts, axis=-1)

    # ---- output slab layout --------------------------------------------------
    out_sizes = [("h1", H1), ("c1", H1), ("h2", H2), ("c2", H2), ("h3", H3), ("c3", H3)]
    out_off, off = {}, 0
    for name, n in out_sizes:
        out_off[name] = off
        off += n
    out_width = _round_up(off, 128)

    kernel = _make_kernel(i_size, H1, H2, H3, in_off, packed["w_off"], out_off)

    flops = 2 * B * ((i_size + H1) * 4 * H1 + H1 * 4 * H2 + H2 * 4 * H2
                     + H2 * 4 * H3 + H3 * 4 * H3)
    transcendentals = B * 5 * (H1 + H2 + H3)    # 3H sigmoid-exps + 2H tanhs per cell
    bytes_accessed = 4 * (in_packed.size + packed["w"].size + packed["b"].size
                          + B * out_width)

    vmem = pl.BlockSpec(memory_space=pltpu.MemorySpace.VMEM)
    out = pl.pallas_call(
        kernel,
        out_shape=jax.ShapeDtypeStruct((B, out_width), jnp.float32),
        in_specs=[vmem, vmem, vmem],
        out_specs=vmem,
        cost_estimate=pl.CostEstimate(flops=flops,
                                      transcendentals=transcendentals,
                                      bytes_accessed=bytes_accessed),
    )(in_packed, packed["w"], packed["b"])

    def take(name, n):
        o = out_off[name]
        return out[:, o:o + n]

    hid_lay1, c_lay1 = take("h1", H1), take("c1", H1)
    hid_lay2, c_lay2 = take("h2", H2), take("c2", H2)
    hid_out, c_out = take("h3", H3), take("c3", H3)
    return ((hid_out, c_out), (hid_lay1, c_lay1), (hid_lay2, c_lay2))


# ---------------------------------------------------------------------------
# Pure-JAX reference (same math as torch.nn.LSTMCell, original gate order)
# ---------------------------------------------------------------------------
def _ref_lstm_cell(x, h, c, p):
    gates = x @ p["w_ih"].T + h @ p["w_hh"].T + p["b_ih"] + p["b_hh"]
    H = h.shape[1]
    i_g = jax.nn.sigmoid(gates[:, 0 * H:1 * H])
    f_g = jax.nn.sigmoid(gates[:, 1 * H:2 * H])
    g_g = jnp.tanh(gates[:, 2 * H:3 * H])
    o_g = jax.nn.sigmoid(gates[:, 3 * H:4 * H])
    c_new = f_g * c + i_g * g_g
    return o_g * jnp.tanh(c_new), c_new


if __name__ == "__main__":
    batch = 8
    i_size = 16
    hidden_size = 32
    num_classes = 8

    key = jax.random.PRNGKey(0)
    k_params, k_inputs = jax.random.split(key)
    kp1, kp2, kp3 = jax.random.split(k_params, 3)
    raw_params = {
        "lay1": make_lstm_cell_params(kp1, i_size, hidden_size),
        "lay2": make_lstm_cell_params(kp2, hidden_size, hidden_size),
        "out":  make_lstm_cell_params(kp3, hidden_size, num_classes),
    }
    packed_params = pack_params(raw_params, i_size, hidden_size, hidden_size, num_classes)

    kx, kh0, kc0, kh1, kc1, kh2, kc2 = jax.random.split(k_inputs, 7)
    x_in = jax.random.normal(kx, (batch, i_size), dtype=jnp.float32)
    h0 = jax.random.normal(kh0, (batch, hidden_size), dtype=jnp.float32)
    c0 = jax.random.normal(kc0, (batch, hidden_size), dtype=jnp.float32)
    h1 = jax.random.normal(kh1, (batch, hidden_size), dtype=jnp.float32)
    c1 = jax.random.normal(kc1, (batch, hidden_size), dtype=jnp.float32)
    h2 = jax.random.normal(kh2, (batch, num_classes), dtype=jnp.float32)
    c2 = jax.random.normal(kc2, (batch, num_classes), dtype=jnp.float32)

    # jit the wrapper so the input packing fuses; packed_params are closure constants
    # (keeps the static layout offsets as Python ints).
    fwd = jax.jit(lambda *s: wifi_full_lstm_cells_forward(packed_params, *s))
    out = fwd(x_in, h0, c0, h1, c1, h2, c2)
    out = jax.block_until_ready(out)

    # Reference check (uses the original, un-permuted / un-fused weights).
    r1_h, r1_c = _ref_lstm_cell(x_in, h0, c0, raw_params["lay1"])
    r2_h, r2_c = _ref_lstm_cell(r1_h, h1, c1, raw_params["lay2"])
    r3_h, r3_c = _ref_lstm_cell(r2_h, h2, c2, raw_params["out"])
    ref = ((r3_h, r3_c), (r1_h, r1_c), (r2_h, r2_c))
    for got_pair, ref_pair in zip(out, ref):
        for got, want in zip(got_pair, ref_pair):
            assert jnp.allclose(got, want, atol=1e-5, rtol=1e-5)

    print("KERNEL_OK")
</pallas_src>

<mosaic_0001>
module attributes {stable_mosaic.version = 11 : i64} {
  func.func @kernel(%arg0: memref<8x256xf32, #tpu.memory_space<vmem>>, %arg1: memref<152x128xf32, #tpu.memory_space<vmem>>, %arg2: memref<3x128xf32, #tpu.memory_space<vmem>>, %arg3: memref<8x256xf32, #tpu.memory_space<vmem>>) attributes {dimension_semantics = [], scalar_prefetch = 0 : i64, scratch_operands = 0 : i64, tpu.core_type = #tpu.core_type<tc>} {
    %c0 = arith.constant 0 : index
    %c0_0 = arith.constant 0 : index
    %0 = vector.load %arg0[%c0, %c0_0] : memref<8x256xf32, #tpu.memory_space<vmem>>, vector<8x256xf32>
    %1 = vector.extract_strided_slice %0 {offsets = [0, 0], sizes = [8, 48], strides = [1, 1]} : vector<8x256xf32> to vector<8x48xf32>
    %2 = vector.extract_strided_slice %0 {offsets = [0, 48], sizes = [8, 32], strides = [1, 1]} : vector<8x256xf32> to vector<8x32xf32>
    %c0_1 = arith.constant 0 : index
    %c0_2 = arith.constant 0 : index
    %3 = vector.load %arg1[%c0_1, %c0_2] : memref<152x128xf32, #tpu.memory_space<vmem>>, vector<48x128xf32>
    %cst = arith.constant dense<0.000000e+00> : vector<8x128xf32>
    %4 = tpu.matmul %1, %3, %cst {dimension_numbers = #tpu.dot_dimension_numbers<[1], [0], [0], [1], [0, 0, 1, 1], [], []>} : vector<8x48xf32>, vector<48x128xf32>, vector<8x128xf32> -> vector<8x128xf32>
    %c0_3 = arith.constant 0 : index
    %c0_4 = arith.constant 0 : index
    %5 = vector.load %arg2[%c0_3, %c0_4] : memref<3x128xf32, #tpu.memory_space<vmem>>, vector<1x128xf32>
    %6 = vector.broadcast %5 : vector<1x128xf32> to vector<8x128xf32>
    %7 = arith.addf %4, %6 : vector<8x128xf32>
    %8 = vector.extract_strided_slice %7 {offsets = [0, 0], sizes = [8, 96], strides = [1, 1]} : vector<8x128xf32> to vector<8x96xf32>
    %cst_5 = arith.constant 0.000000e+00 : f32
    %9 = vector.broadcast %cst_5 : f32 to vector<8x96xf32>
    %10 = arith.subf %9, %8 : vector<8x96xf32>
    %11 = math.exp %10 : vector<8x96xf32>
    %cst_6 = arith.constant 1.000000e+00 : f32
    %12 = vector.broadcast %cst_6 : f32 to vector<8x96xf32>
    %13 = arith.addf %12, %11 : vector<8x96xf32>
    %14 = tpu.reciprocal %13 : vector<8x96xf32> -> vector<8x96xf32>
    %15 = vector.extract_strided_slice %14 {offsets = [0, 0], sizes = [8, 32], strides = [1, 1]} : vector<8x96xf32> to vector<8x32xf32>
    %16 = vector.extract_strided_slice %14 {offsets = [0, 32], sizes = [8, 32], strides = [1, 1]} : vector<8x96xf32> to vector<8x32xf32>
    %17 = vector.extract_strided_slice %14 {offsets = [0, 64], sizes = [8, 32], strides = [1, 1]} : vector<8x96xf32> to vector<8x32xf32>
    %18 = vector.extract_strided_slice %7 {offsets = [0, 96], sizes = [8, 32], strides = [1, 1]} : vector<8x128xf32> to vector<8x32xf32>
    %19 = math.tanh %18 : vector<8x32xf32>
    %20 = arith.mulf %16, %2 : vector<8x32xf32>
    %21 = arith.mulf %15, %19 : vector<8x32xf32>
    %22 = arith.addf %20, %21 : vector<8x32xf32>
    %23 = math.tanh %22 : vector<8x32xf32>
    %24 = arith.mulf %17, %23 : vector<8x32xf32>
    %25 = vector.extract_strided_slice %0 {offsets = [0, 80], sizes = [8, 32], strides = [1, 1]} : vector<8x256xf32> to vector<8x32xf32>
    %26 = vector.extract_strided_slice %0 {offsets = [0, 128], sizes = [8, 32], strides = [1, 1]} : vector<8x256xf32> to vector<8x32xf32>
    %c48 = arith.constant 48 : index
    %c0_7 = arith.constant 0 : index
    %27 = vector.load %arg1[%c48, %c0_7] : memref<152x128xf32, #tpu.memory_space<vmem>>, vector<32x128xf32>
    %cst_8 = arith.constant dense<0.000000e+00> : vector<8x128xf32>
    %28 = tpu.matmul %24, %27, %cst_8 {dimension_numbers = #tpu.dot_dimension_numbers<[1], [0], [0], [1], [0, 0, 1, 1], [], []>} : vector<8x32xf32>, vector<32x128xf32>, vector<8x128xf32> -> vector<8x128xf32>
    %c80 = arith.constant 80 : index
    %c0_9 = arith.constant 0 : index
    %29 = vector.load %arg1[%c80, %c0_9] : memref<152x128xf32, #tpu.memory_space<vmem>>, vector<32x128xf32>
    %cst_10 = arith.constant dense<0.000000e+00> : vector<8x128xf32>
    %30 = tpu.matmul %25, %29, %cst_10 {dimension_numbers = #tpu.dot_dimension_numbers<[1], [0], [0], [1], [0, 0, 1, 1], [], []>} : vector<8x32xf32>, vector<32x128xf32>, vector<8x128xf32> -> vector<8x128xf32>
    %31 = arith.addf %28, %30 : vector<8x128xf32>
    %c1 = arith.constant 1 : index
    %c0_11 = arith.constant 0 : index
    %32 = vector.load %arg2[%c1, %c0_11] : memref<3x128xf32, #tpu.memory_space<vmem>>, vector<1x128xf32>
    %33 = vector.broadcast %32 : vector<1x128xf32> to vector<8x128xf32>
    %34 = arith.addf %31, %33 : vector<8x128xf32>
    %35 = vector.extract_strided_slice %34 {offsets = [0, 0], sizes = [8, 96], strides = [1, 1]} : vector<8x128xf32> to vector<8x96xf32>
    %cst_12 = arith.constant 0.000000e+00 : f32
    %36 = vector.broadcast %cst_12 : f32 to vector<8x96xf32>
    %37 = arith.subf %36, %35 : vector<8x96xf32>
    %38 = math.exp %37 : vector<8x96xf32>
    %cst_13 = arith.constant 1.000000e+00 : f32
    %39 = vector.broadcast %cst_13 : f32 to vector<8x96xf32>
    %40 = arith.addf %39, %38 : vector<8x96xf32>
    %41 = tpu.reciprocal %40 : vector<8x96xf32> -> vector<8x96xf32>
    %42 = vector.extract_strided_slice %41 {offsets = [0, 0], sizes = [8, 32], strides = [1, 1]} : vector<8x96xf32> to vector<8x32xf32>
    %43 = vector.extract_strided_slice %41 {offsets = [0, 32], sizes = [8, 32], strides = [1, 1]} : vector<8x96xf32> to vector<8x32xf32>
    %44 = vector.extract_strided_slice %41 {offsets = [0, 64], sizes = [8, 32], strides = [1, 1]} : vector<8x96xf32> to vector<8x32xf32>
    %45 = vector.extract_strided_slice %34 {offsets = [0, 96], sizes = [8, 32], strides = [1, 1]} : vector<8x128xf32> to vector<8x32xf32>
    %46 = math.tanh %45 : vector<8x32xf32>
    %47 = arith.mulf %43, %26 : vector<8x32xf32>
    %48 = arith.mulf %42, %46 : vector<8x32xf32>
    %49 = arith.addf %47, %48 : vector<8x32xf32>
    %50 = math.tanh %49 : vector<8x32xf32>
    %51 = arith.mulf %44, %50 : vector<8x32xf32>
    %52 = vector.extract_strided_slice %0 {offsets = [0, 112], sizes = [8, 8], strides = [1, 1]} : vector<8x256xf32> to vector<8x8xf32>
    %53 = vector.extract_strided_slice %0 {offsets = [0, 120], sizes = [8, 8], strides = [1, 1]} : vector<8x256xf32> to vector<8x8xf32>
    %c112 = arith.constant 112 : index
    %c0_14 = arith.constant 0 : index
    %54 = vector.load %arg1[%c112, %c0_14] : memref<152x128xf32, #tpu.memory_space<vmem>>, vector<32x128xf32>
    %cst_15 = arith.constant dense<0.000000e+00> : vector<8x128xf32>
    %55 = tpu.matmul %51, %54, %cst_15 {dimension_numbers = #tpu.dot_dimension_numbers<[1], [0], [0], [1], [0, 0, 1, 1], [], []>} : vector<8x32xf32>, vector<32x128xf32>, vector<8x128xf32> -> vector<8x128xf32>
    %c144 = arith.constant 144 : index
    %c0_16 = arith.constant 0 : index
    %56 = vector.load %arg1[%c144, %c0_16] : memref<152x128xf32, #tpu.memory_space<vmem>>, vector<8x128xf32>
    %cst_17 = arith.constant dense<0.000000e+00> : vector<8x128xf32>
    %57 = tpu.matmul %52, %56, %cst_17 {dimension_numbers = #tpu.dot_dimension_numbers<[1], [0], [0], [1], [0, 0, 1, 1], [], []>} : vector<8x8xf32>, vector<8x128xf32>, vector<8x128xf32> -> vector<8x128xf32>
    %58 = arith.addf %55, %57 : vector<8x128xf32>
    %c2 = arith.constant 2 : index
    %c0_18 = arith.constant 0 : index
    %59 = vector.load %arg2[%c2, %c0_18] : memref<3x128xf32, #tpu.memory_space<vmem>>, vector<1x128xf32>
    %60 = vector.broadcast %59 : vector<1x128xf32> to vector<8x128xf32>
    %61 = arith.addf %58, %60 : vector<8x128xf32>
    %62 = vector.extract_strided_slice %61 {offsets = [0, 0], sizes = [8, 32], strides = [1, 1]} : vector<8x128xf32> to vector<8x32xf32>
    %63 = vector.extract_strided_slice %62 {offsets = [0, 0], sizes = [8, 24], strides = [1, 1]} : vector<8x32xf32> to vector<8x24xf32>
    %cst_19 = arith.constant 0.000000e+00 : f32
    %64 = vector.broadcast %cst_19 : f32 to vector<8x24xf32>
    %65 = arith.subf %64, %63 : vector<8x24xf32>
    %66 = math.exp %65 : vector<8x24xf32>
    %cst_20 = arith.constant 1.000000e+00 : f32
    %67 = vector.broadcast %cst_20 : f32 to vector<8x24xf32>
    %68 = arith.addf %67, %66 : vector<8x24xf32>
    %69 = tpu.reciprocal %68 : vector<8x24xf32> -> vector<8x24xf32>
    %70 = vector.extract_strided_slice %69 {offsets = [0, 0], sizes = [8, 8], strides = [1, 1]} : vector<8x24xf32> to vector<8x8xf32>
    %71 = vector.extract_strided_slice %69 {offsets = [0, 8], sizes = [8, 8], strides = [1, 1]} : vector<8x24xf32> to vector<8x8xf32>
    %72 = vector.extract_strided_slice %69 {offsets = [0, 16], sizes = [8, 8], strides = [1, 1]} : vector<8x24xf32> to vector<8x8xf32>
    %73 = vector.extract_strided_slice %62 {offsets = [0, 24], sizes = [8, 8], strides = [1, 1]} : vector<8x32xf32> to vector<8x8xf32>
    %74 = math.tanh %73 : vector<8x8xf32>
    %75 = arith.mulf %71, %53 : vector<8x8xf32>
    %76 = arith.mulf %70, %74 : vector<8x8xf32>
    %77 = arith.addf %75, %76 : vector<8x8xf32>
    %78 = math.tanh %77 : vector<8x8xf32>
    %79 = arith.mulf %72, %78 : vector<8x8xf32>
    %cst_21 = arith.constant 0.000000e+00 : f32
    %80 = vector.broadcast %cst_21 : f32 to vector<8x256xf32>
    %c0_22 = arith.constant 0 : index
    %c0_23 = arith.constant 0 : index
    %81 = vector.load %arg3[%c0_22, %c0_23] : memref<8x256xf32, #tpu.memory_space<vmem>>, vector<8x256xf32>
    tpu.vector_store %arg3[%c0_22, %c0_23], %80 {strides = array<i32>} : memref<8x256xf32, #tpu.memory_space<vmem>>, vector<8x256xf32>,
    %c0_24 = arith.constant 0 : index
    %c0_25 = arith.constant 0 : index
    %82 = vector.load %arg3[%c0_24, %c0_25] : memref<8x256xf32, #tpu.memory_space<vmem>>, vector<8x32xf32>
    tpu.vector_store %arg3[%c0_24, %c0_25], %24 {strides = array<i32>} : memref<8x256xf32, #tpu.memory_space<vmem>>, vector<8x32xf32>,
    %c0_26 = arith.constant 0 : index
    %c32 = arith.constant 32 : index
    %83 = vector.load %arg3[%c0_26, %c32] : memref<8x256xf32, #tpu.memory_space<vmem>>, vector<8x32xf32>
    tpu.vector_store %arg3[%c0_26, %c32], %22 {strides = array<i32>} : memref<8x256xf32, #tpu.memory_space<vmem>>, vector<8x32xf32>,
    %c0_27 = arith.constant 0 : index
    %c64 = arith.constant 64 : index
    %84 = vector.load %arg3[%c0_27, %c64] : memref<8x256xf32, #tpu.memory_space<vmem>>, vector<8x32xf32>
    tpu.vector_store %arg3[%c0_27, %c64], %51 {strides = array<i32>} : memref<8x256xf32, #tpu.memory_space<vmem>>, vector<8x32xf32>,
    %c0_28 = arith.constant 0 : index
    %c96 = arith.constant 96 : index
    %85 = vector.load %arg3[%c0_28, %c96] : memref<8x256xf32, #tpu.memory_space<vmem>>, vector<8x32xf32>
    tpu.vector_store %arg3[%c0_28, %c96], %49 {strides = array<i32>} : memref<8x256xf32, #tpu.memory_space<vmem>>, vector<8x32xf32>,
    %c0_29 = arith.constant 0 : index
    %c128 = arith.constant 128 : index
    %86 = vector.load %arg3[%c0_29, %c128] : memref<8x256xf32, #tpu.memory_space<vmem>>, vector<8x8xf32>
    tpu.vector_store %arg3[%c0_29, %c128], %79 {strides = array<i32>} : memref<8x256xf32, #tpu.memory_space<vmem>>, vector<8x8xf32>,
    %c0_30 = arith.constant 0 : index
    %c136 = arith.constant 136 : index
    %87 = vector.load %arg3[%c0_30, %c136] : memref<8x256xf32, #tpu.memory_space<vmem>>, vector<8x8xf32>
    tpu.vector_store %arg3[%c0_30, %c136], %77 {strides = array<i32>} : memref<8x256xf32, #tpu.memory_space<vmem>>, vector<8x8xf32>,
    return
  }
}

</mosaic_0001>

<bundles_post_ra>
// kernel: _lambda_.1
= control target key start
LH: loop header
LB: loop body
LE: loop exit
PB: predicated region body
PF: predicated region fallthrough
CT: control target
= control target key end

     0   :  { %8 = vsyncpa [#allocation3], 0  ;;  %s393_s15 = smov [#allocation2]   ;;  %s394_s17 = smov 128   ;;  %s492_s0 = inlined_call_operand.vmem [shape: f32[8,256], index: 0, kind: input, shape index: {}]   ;;  %s493_s1 = inlined_call_operand.hbm [shape: f32[152,128], index: 1, kind: input, shape index: {}]   ;;  %s494_s2 = inlined_call_operand.vmem [shape: f32[3,128], index: 2, kind: input, shape index: {}]   ;;  %s495_s3 = inlined_call_operand.vmem [shape: f32[8,256], index: 3, kind: output, shape index: {}]  }
   0x1   :  { %s15_s14 = sshll.u32 %s493_s1, 4  ;;  %s17_s16 = sshll.u32 %s393_s15, 4  ;;  %s16_s14 = int_to_ptr.hbm [resolvable:$true] %s15_s14  ;;  %s18_s16 = int_to_ptr.vmem [resolvable:$true] %s17_s16 }
   0x2   :  { %s395_s18 = smov 8  }
   0x3   :  { %23 = dma.hbm_to_vmem [thread:$0]  %s16_s14, 2432, %s18_s16, [#allocation3], %s394_s17, %s394_s17, %s395_s18  }
   0x4   :  { %391 = dma.done.wait [#allocation3], 2432  }
   0x5   :  { %392 = vsyncadd [#allocation3], 4294964864  ;;  %v37_v0 = vld [vmem:[#allocation2 + $0x28] sm:$0xff]  ;;  %v36_v1 = vld [vmem:[#allocation2 + $0x20] sm:$0xff]  ;;  %vm40_vm0 = vcmask 392192   ;;  %s396_s22 = smov 32  }
   0x6   :  { %54 = vmatpush.msra.mxu0 %v37_v0  ;;  %v35_v2 = vld [vmem:[#allocation2 + $0x18] sm:$0xff]  ;;  %v34_v3 = vld [vmem:[#allocation2 + $0x10] sm:$0xff]  ;;  %v33_v4 = vld [vmem:[#allocation2 + $0x8] sm:$0xff]  ;;  %s397_s23 = smov 112   ;;  %v398_v34 = vmov 0.0   ;;  %s399_s28 = smov 64  }
   0x7   :  { %v32_v5 = vld [vmem:[#allocation2] sm:$0xff]  ;;  %v106_v32 = vld [vmem:[#allocation2 + $0x48] sm:$0xff]  ;;  %299 = vst [vmem:[%s495_s3] sm:$0xff] %v398_v34  ;;  %v104_v35 = vld [vmem:[#allocation2 + $0x38] sm:$0xff]  ;;  %s400_s29 = smov 48   ;;  %vm113_vm5 = vcmask 261120   ;;  %vm303_vm6 = vcmask 523520  }
   0x8   :  { %55 = vmatpush.msra.mxu0 %v36_v1  ;;  %v430_v6 = vld [vmem:[%s492_s0] sm:$0xff]  ;;  %153 = vmatpush.msra.mxu2 %v106_v32  ;;  %300 = vst [vmem:[%s495_s3 + $0x8] sm:$0xff] %v398_v34  ;;  %v103_v36 = vld [vmem:[#allocation2 + $0x30] sm:$0xff]  ;;  %v110_v39 = vld [vmem:[#allocation2 + $0x68] sm:$0xff]  ;;  %s401_s10 = smov 16   ;;  %vm211_vm11 = vcmask 64512  }
   0x9   :  { %v340_v7 = vld [vmem:[%s494_s2] ss:$0 sm:$0xff]  ;;  %128 = vmatpush.msra.mxu1 %v110_v39  ;;  %v108_v41 = vld [vmem:[#allocation2 + $0x58] sm:$0xff]  ;;  %v107_v42 = vld [vmem:[#allocation2 + $0x50] sm:$0xff]  ;;  %vm305_vm12 = vcmask 785920   ;;  %s402_s15 = smov 104  }
   0xa   :  { %56 = vmatpush.msra.mxu0 %v35_v2  ;;  %v105_v33 = vld [vmem:[#allocation2 + $0x40] sm:$0xff]  ;;  %v31_v43 = vld [vmem:[%s492_s0 + $0x8] sm:$0xff] }
   0xb   :  { %154 = vmatpush.msra.mxu2 %v105_v33  ;;  %v109_v40 = vld [vmem:[#allocation2 + $0x60] sm:$0xff] }
   0xc   :  { %57 = vmatpush.msra.mxu0 %v34_v3  ;;  %129 = vmatpush.msra.mxu1 %v109_v40  ;;  %v341_v46 = vld [vmem:[%s494_s2 + $0x1] ss:$0 sm:$0xff] }
   0xd   :  { %155 = vmatpush.msra.mxu2 %v104_v35 }
   0xe   :  { %58 = vmatpush.msra.mxu0 %v33_v4  ;;  %130 = vmatpush.msra.mxu1 %v108_v41 }
   0xf   :  { %156 = vmatpush.msra.mxu2 %v103_v36 }
  0x10   :  { %59 = vmatpush.msra.mxu0 %v32_v5  ;;  %131 = vmatpush.msra.mxu1 %v107_v42 }
  0x11   :  { %325 = vmatmul.msk.f32.vlgmr.msra.gmra.mxu0 %vm40_vm0, %v430_v6 }
  0x8e   :  { %v61_v8 = vpop.f32.mrf.mxu0 }
  0x8f   :  { %v62_v9 = vadd.f32 %v340_v7, %v61_v8 }
  0x91   :  { %343 = vtanh.f32 %v62_v9  ;;  %v64_v11 = vsub.f32 0.0, %v62_v9  ;;  %v208_v9 = vld [vmem:[#allocation2 + $0x90] sm:$0xff] }
  0x92   :  { %229 = vmatpush.msra.mxu3 %v208_v9 }
  0x93   :  { %v65_v12 = vmul.f32 1.442695, %v64_v11  ;;  %v207_v11 = vld [vmem:[#allocation2 + $0x88] sm:$0xff] }
  0x94   :  { %251 = vmatpush.msrb.mxu3 %v207_v11 }
  0x95   :  { %345 = vpow2.f32 %v65_v12  ;;  %v206_v12 = vld [vmem:[#allocation2 + $0x80] sm:$0xff] }
  0x96   :  { %252 = vmatpush.msrb.mxu3 %v206_v12 }
  0x97   :  { %v344_v10 = vpop.eup %343 }
  0x98   :  { %88 = vrot.lane.b32.xlu0 %v344_v10, %s396_s22 }
  0x9b   :  { %v346_v13 = vpop.eup %345 }
  0x9c   :  { %v67_v14 = vadd.f32 1.0, %v346_v13  ;;  %v205_v13 = vld [vmem:[#allocation2 + $0x78] sm:$0xff] }
  0x9d   :  { %253 = vmatpush.msrb.mxu3 %v205_v13 }
  0x9e   :  { %347 = vrcp.f32 %v67_v14  ;;  %v79_v20 = vand.u32 2147483648, %v67_v14  ;;  %vm73_vm2 = vweird.f32 %v67_v14  ;;  %v77_v21 = vand.u32 2147483647, %v67_v14 }
  0xa0   :  { %83 = vrot.lane.b32.xlu0 %v430_v6, %s397_s23  ;;  %v80_v23 = vor.u32 1.1754944e-38, %v79_v20  ;;  %vm78_vm4 = vcmp.eq.f32.partialorder %v77_v21, 8.507059e+37 }
  0xa4   :  { %v348_v15 = vpop.eup %347 }
  0xa5   :  { %v69_v16 = vmul.f32 %v348_v15, %v67_v14  ;;  %vm74_vm1 = vweird.f32 %v348_v15  ;;  %v204_v14 = vld [vmem:[#allocation2 + $0x70] sm:$0xff] }
  0xa6   :  { %vm75_vm3 = vmor %vm73_vm2, %vm74_vm1  ;;  %254 = vmatpush.msrb.mxu3 %v204_v14  ;;  %vm311_vm1 = vcmask 1048320   ;;  %vm318_vm2 = vcmask 130112  }
  0xa7   :  { %v70_v17 = vsub.f32 1.0, %v69_v16 }
  0xa9   :  { %v71_v18 = vmul.f32 %v348_v15, %v70_v17 }
  0xab   :  { %v72_v19 = vadd.f32 %v348_v15, %v71_v18 }
  0xad   :  { %v76_v22 = vsel %vm75_vm3, %v348_v15, %v72_v19  ;;  %v342_v19 = vld [vmem:[%s494_s2 + $0x2] ss:$0 sm:$0xff] }
  0xae   :  { %v81_v25 = vsel %vm78_vm4, %v80_v23, %v76_v22 }
 0x10a   :  { %v89_v24 = vpop.permute.xlu0 %88 }
 0x10b   :  { %v91_v26 = vmul.f32 %v89_v24, %v81_v25 }
 0x10d   :  { %93 = vrot.lane.b32.xlu1 %v91_v26, %s396_s22 }
 0x112   :  { %v84_v27 = vpop.permute.xlu0 %83 }
 0x113   :  { %v86_v28 = vmul.f32 %v84_v27, %v81_v25 }
 0x17f   :  { %v94_v29 = vpop.permute.xlu1 %93 }
 0x180   :  { %v96_v30 = vadd.f32 %v94_v29, %v86_v28 }
 0x182   :  { %349 = vtanh.f32 %v96_v30 }
 0x188   :  { %v350_v31 = vpop.eup %349 }
 0x189   :  { %99 = vrot.lane.b32.xlu1 %v350_v31, %s396_s22 }
 0x191   :  { %184 = vrot.lane.b32.xlu1 %v31_v43, %s396_s22 }
 0x199   :  { %209 = vrot.lane.b32.xlu1 %v430_v6, %s401_s10 }
 0x1fb   :  { %v100_v37 = vpop.permute.xlu1 %99 }
 0x1fc   :  { %v102_v38 = vmul.f32 %v100_v37, %v81_v25 }
 0x1fe   :  { %137 = vrot.lane.b32.xlu2 %v102_v38, %s399_s28 }
 0x203   :  { %v185_v4 = vpop.permute.xlu1 %184 }
 0x206   :  { %111 = vrot.lane.b32.xlu2 %v430_v6, %s400_s29 }
 0x20b   :  { %v210_v10 = vpop.permute.xlu1 %209 }
 0x20c   :  { %328 = vmatmul.msk.f32.vlgmr.msra.gmra.mxu3 %vm211_vm11, %v210_v10 }
 0x258   :  { %v138_v44 = vpop.permute.xlu2 %137 }
 0x259   :  { %302 = vst.msk [vmem:[%s495_s3] sm:$0xff] %vm113_vm5, %v138_v44  ;;  %327 = vmatmul.msk.f32.vlgmr.msra.gmra.mxu2 %vm113_vm5, %v138_v44 }
 0x25a   :  { %304 = vst.msk [vmem:[%s495_s3] sm:$0xff] %vm303_vm6, %v96_v30 }
 0x260   :  { %v112_v45 = vpop.permute.xlu2 %111 }
 0x261   :  { %326 = vmatmul.msk.f32.vlgmr.msra.gmra.mxu1 %vm113_vm5, %v112_v45 }
 0x28f   :  { %v231_v18 = vpop.f32.mrf.mxu3 }
 0x2dc   :  { %v158_v47 = vpop.f32.mrf.mxu2 }
 0x2de   :  { %v133_v48 = vpop.f32.mrf.mxu1 }
 0x2df   :  { %v159_v49 = vadd.f32 %v158_v47, %v133_v48 }
 0x2e1   :  { %v163_v50 = vadd.f32 %v341_v46, %v159_v49 }
 0x2e3   :  { %351 = vtanh.f32 %v163_v50  ;;  %v164_v52 = vsub.f32 0.0, %v163_v50 }
 0x2e5   :  { %v165_v53 = vmul.f32 1.442695, %v164_v52 }
 0x2e7   :  { %353 = vpow2.f32 %v165_v53 }
 0x2e9   :  { %v352_v51 = vpop.eup %351 }
 0x2ea   :  { %189 = vrot.lane.b32.xlu0 %v352_v51, %s396_s22 }
 0x2ed   :  { %v354_v54 = vpop.eup %353 }
 0x2ee   :  { %v167_v55 = vadd.f32 1.0, %v354_v54 }
 0x2f0   :  { %355 = vrcp.f32 %v167_v55  ;;  %v179_v61 = vand.u32 2147483648, %v167_v55  ;;  %vm173_vm8 = vweird.f32 %v167_v55  ;;  %v177_v62 = vand.u32 2147483647, %v167_v55 }
 0x2f2   :  { %v180_v0 = vor.u32 1.1754944e-38, %v179_v61  ;;  %vm178_vm10 = vcmp.eq.f32.partialorder %v177_v62, 8.507059e+37 }
 0x2f6   :  { %v356_v56 = vpop.eup %355 }
 0x2f7   :  { %v169_v57 = vmul.f32 %v356_v56, %v167_v55  ;;  %vm174_vm7 = vweird.f32 %v356_v56 }
 0x2f8   :  { %vm175_vm9 = vmor %vm173_vm8, %vm174_vm7 }
 0x2f9   :  { %v170_v58 = vsub.f32 1.0, %v169_v57 }
 0x2fb   :  { %v171_v59 = vmul.f32 %v356_v56, %v170_v58 }
 0x2fd   :  { %v172_v60 = vadd.f32 %v356_v56, %v171_v59 }
 0x2ff   :  { %v176_v63 = vsel %vm175_vm9, %v356_v56, %v172_v60 }
 0x300   :  { %v181_v1 = vsel %vm178_vm10, %v180_v0, %v176_v63 }
 0x301   :  { %v187_v5 = vmul.f32 %v185_v4, %v181_v1 }
 0x35c   :  { %v190_v2 = vpop.permute.xlu0 %189 }
 0x35d   :  { %v192_v3 = vmul.f32 %v190_v2, %v181_v1 }
 0x35f   :  { %194 = vrot.lane.b32.xlu2 %v192_v3, %s396_s22 }
 0x3b9   :  { %v195_v6 = vpop.permute.xlu2 %194 }
 0x3ba   :  { %v197_v7 = vadd.f32 %v195_v6, %v187_v5 }
 0x3bc   :  { %357 = vtanh.f32 %v197_v7 }
 0x3c2   :  { %v358_v8 = vpop.eup %357 }
 0x3c3   :  { %200 = vrot.lane.b32.xlu0 %v358_v8, %s396_s22 }
 0x435   :  { %v201_v15 = vpop.permute.xlu0 %200 }
 0x436   :  { %v203_v16 = vmul.f32 %v201_v15, %v181_v1 }
 0x438   :  { %235 = vrot.lane.b32.xlu2 %v203_v16, %s399_s28  ;;  %306 = vst.msk [vmem:[%s495_s3] sm:$0xff] %vm305_vm12, %v203_v16 }
 0x492   :  { %v236_v17 = vpop.permute.xlu2 %235 }
 0x493   :  { %329 = vmatmul.msk.f32.vlgmr.msrb.gmra.mxu3 %vm113_vm5, %v236_v17 }
 0x516   :  { %v256_v20 = vpop.f32.mrf.mxu3 }
 0x517   :  { %v257_v21 = vadd.f32 %v256_v20, %v231_v18 }
 0x519   :  { %v261_v22 = vadd.f32 %v342_v19, %v257_v21 }
 0x51b   :  { %359 = vtanh.f32 %v261_v22  ;;  %v262_v24 = vsub.f32 0.0, %v261_v22 }
 0x51d   :  { %v263_v25 = vmul.f32 1.442695, %v262_v24 }
 0x51f   :  { %361 = vpow2.f32 %v263_v25 }
 0x521   :  { %v360_v23 = vpop.eup %359 }
 0x522   :  { %284 = vrot.lane.b32.xlu0 %v360_v23, %s402_s15 }
 0x525   :  { %v362_v26 = vpop.eup %361 }
 0x526   :  { %v265_v27 = vadd.f32 1.0, %v362_v26 }
 0x528   :  { %363 = vrcp.f32 %v265_v27  ;;  %v277_v33 = vand.u32 2147483648, %v265_v27  ;;  %vm271_vm14 = vweird.f32 %v265_v27  ;;  %v275_v34 = vand.u32 2147483647, %v265_v27 }
 0x52a   :  { %v278_v36 = vor.u32 1.1754944e-38, %v277_v33  ;;  %vm276_vm0 = vcmp.eq.f32.partialorder %v275_v34, 8.507059e+37 }
 0x52e   :  { %v364_v28 = vpop.eup %363 }
 0x52f   :  { %v267_v29 = vmul.f32 %v364_v28, %v265_v27  ;;  %vm272_vm13 = vweird.f32 %v364_v28 }
 0x530   :  { %vm273_vm15 = vmor %vm271_vm14, %vm272_vm13 }
 0x531   :  { %v268_v30 = vsub.f32 1.0, %v267_v29 }
 0x533   :  { %v269_v31 = vmul.f32 %v364_v28, %v268_v30 }
 0x535   :  { %v270_v32 = vadd.f32 %v364_v28, %v269_v31 }
 0x537   :  { %v274_v35 = vsel %vm273_vm15, %v364_v28, %v270_v32 }
 0x538   :  { %v279_v38 = vsel %vm276_vm0, %v278_v36, %v274_v35 }
 0x539   :  { %v282_v40 = vmul.f32 %v279_v38, %v210_v10 }
 0x594   :  { %v285_v37 = vpop.permute.xlu0 %284 }
 0x595   :  { %v287_v39 = vmul.f32 %v285_v37, %v279_v38 }
 0x597   :  { %289 = vrot.lane.b32.xlu1 %v287_v39, %s395_s18 }
 0x59f   :  { %308 = vrot.lane.b32.xlu1 %v197_v7, %s399_s28 }
 0x609   :  { %v290_v41 = vpop.permute.xlu1 %289 }
 0x60a   :  { %v292_v42 = vadd.f32 %v290_v41, %v282_v40 }
 0x60c   :  { %365 = vtanh.f32 %v292_v42 }
 0x611   :  { %v309_v43 = vpop.permute.xlu1 %308 }
 0x612   :  { %v366_v44 = vpop.eup %365  ;;  %312 = vst.msk [vmem:[%s495_s3] sm:$0xff] %vm311_vm1, %v309_v43 }
 0x613   :  { %295 = vrot.lane.b32.xlu2 %v366_v44, %s395_s18 }
 0x66d   :  { %v296_v45 = vpop.permute.xlu2 %295 }
 0x66e   :  { %v298_v46 = vmul.f32 %v296_v45, %v279_v38 }
 0x670   :  { %314 = vrot.lane.b32.xlu0 %v298_v46, %s397_s23 }
 0x6e2   :  { %v315_v47 = vpop.permute.xlu0 %314 }
 0x6e3   :  { %317 = vst.msk [vmem:[%s495_s3 + $0x8] sm:$0xff] %vm211_vm11, %v315_v47 }
 0x6e4   :  { %319 = vst.msk [vmem:[%s495_s3 + $0x8] sm:$0xff] %vm318_vm2, %v292_v42 }
 0x6e5   :  { %324 = vsyncpa [#allocation3], 1 }

</bundles_post_ra>
